<compile_context>
chip_gen: v7x
topology: tpu7x:2x2x1
jax: 0.10.0
libtpu: 0.0.40
codegen_flags: <defaults>
</compile_context>

<pallas_src>
import functools

import jax
import jax.numpy as jnp
from jax import lax
from jax.experimental import pallas as pl
from jax.experimental.pallas import tpu as pltpu


# ---------------------------------------------------------------------------
# tile-size helpers
# ---------------------------------------------------------------------------
def _largest_aligned_divisor(total: int, target: int, align: int) -> int:
    """Largest divisor of `total` that is a multiple of `align` and <= target.
    Falls back to `total` (full extent is always a legal block)."""
    if total <= target:
        return total
    t = (min(target, total) // align) * align
    while t >= align:
        if total % t == 0:
            return t
        t -= align
    return total


def _largest_divisor_le(total: int, target: int) -> int:
    t = min(total, max(1, target))
    while t > 1:
        if total % t == 0:
            return t
        t -= 1
    return 1


# ---------------------------------------------------------------------------
# Kernel 1: per-model (batched) linear gram with folded centering, K-tiled.
# ---------------------------------------------------------------------------
def _gram_kernel(x_ref, g_ref, acc_ref, *, center: bool, use_bf16: bool):
    """x_ref: (mblk, bs, tk) VMEM,  g_ref/acc_ref: (mblk, bs, bs)."""
    k = pl.program_id(1)

    @pl.when(k == 0)
    def _():
        acc_ref[...] = jnp.zeros_like(acc_ref)

    x = x_ref[...]
    if center:
        # H G H == (H X)(H X)^T for the linear kernel: subtract the per-feature
        # batch mean (cheap sublane reduction, exact per K tile since the batch
        # axis is never tiled).
        xf = x.astype(jnp.float32)
        xf = xf - jnp.mean(xf, axis=1, keepdims=True)
        x = xf.astype(jnp.bfloat16) if use_bf16 else xf
    else:
        x = x.astype(jnp.bfloat16 if use_bf16 else jnp.float32)

    # Batched MXU matmul, f32 accumulation.
    acc_ref[...] += jnp.einsum('mbd,mcd->mbc', x, x,
                               preferred_element_type=jnp.float32)

    @pl.when(k == pl.num_programs(1) - 1)
    def _():
        g_ref[...] = acc_ref[...].astype(g_ref.dtype)


# ---------------------------------------------------------------------------
# Kernel 2: pairwise Frobenius cosine similarity, mean of off-diagonal.
# Reduction over the flattened gram (bs*bs) axis is tiled.
# ---------------------------------------------------------------------------
def _pairwise_cossim_kernel(gflat_ref, out_ref, acc_ref, *, eps: float,
                            mbs: int, off_count: int):
    """gflat_ref: (mbs, tk2) VMEM,  acc_ref: (mbs, mbs) VMEM,  out_ref: (1,1) SMEM."""
    t = pl.program_id(0)

    @pl.when(t == 0)
    def _():
        acc_ref[...] = jnp.zeros_like(acc_ref)

    gf = gflat_ref[...]
    acc_ref[...] += lax.dot_general(gf, gf, (((1,), (1,)), ((), ())),
                                    preferred_element_type=jnp.float32)

    @pl.when(t == pl.num_programs(0) - 1)
    def _():
        m = acc_ref[...]                                     # (mbs, mbs)
        ii = lax.broadcasted_iota(jnp.int32, (mbs, mbs), 0)
        jj = lax.broadcasted_iota(jnp.int32, (mbs, mbs), 1)
        is_diag = ii == jj
        # diag(m) as column / row via masked reductions on the tiny (mbs, mbs)
        # tile (fits one vreg; avoids gathers/transposes of odd shapes).
        sq_col = jnp.sum(jnp.where(is_diag, m, 0.0), axis=1, keepdims=True)
        sq_row = jnp.sum(jnp.where(is_diag, m, 0.0), axis=0, keepdims=True)
        denom = jnp.sqrt(sq_col) * jnp.sqrt(sq_row) + eps
        c = m / denom
        # TODO(synk): kernels.py not provided; assuming reduction='off_diag'
        # means the mean over off-diagonal entries with eps in the denominator.
        off_sum = jnp.sum(jnp.where(is_diag, 0.0, c))
        out_ref[0, 0] = off_sum * (1.0 / off_count)


# ---------------------------------------------------------------------------
# Wrapper
# ---------------------------------------------------------------------------
def cka_model_kernel(feats, *, eps: float = 1e-6, center: bool = True,
                     use_bf16_mxu: bool = False, tk: int = None,
                     tk2: int = None, vmem_limit_bytes: int = 32 * 1024 * 1024):
    """JAX/Pallas equivalent of CKAModelKernel.forward (linear FeatureKernel).

    Returns (pcosim scalar, grams) where grams == track['gram'].
    """
    feats = jnp.asarray(feats, jnp.float32)
    mbs, bs = feats.shape[:2]
    feats = feats.reshape(mbs, bs, -1)          # glue: flatten per-sample dims
    d = feats.shape[-1]

    if mbs < 2:
        # off_diag reduction would divide by zero (NaN in the PyTorch module).
        raise ValueError("CKAModelKernel off_diag reduction requires model_bs >= 2")
    off_count = mbs * (mbs - 1)

    in_dtype = jnp.bfloat16 if use_bf16_mxu else jnp.float32
    in_itemsize = 2 if use_bf16_mxu else 4
    feats = feats.astype(in_dtype)              # bf16 feed halves HBM/VMEM of X tiles

    # --- tile sizing -------------------------------------------------------
    # Block several models per grid step when bs is small (amortize ~0.35us/step).
    mblk = _largest_divisor_le(mbs, max(1, 256 // bs))
    # K tile: bound VMEM independent of D; double-buffered input tiles.
    if tk is None:
        per_row_bytes = mblk * bs * in_itemsize
        tk_cap = max(128, (8 * 1024 * 1024) // max(per_row_bytes, 1))
        tk = _largest_aligned_divisor(d, min(2048, tk_cap), 128)
    assert d % tk == 0 and (tk == d or tk % 128 == 0), "invalid K tile"
    nk = d // tk

    # --- Kernel 1: gram (+ folded centering) -------------------------------
    grams = pl.pallas_call(
        functools.partial(_gram_kernel, center=center, use_bf16=use_bf16_mxu),
        out_shape=jax.ShapeDtypeStruct((mbs, bs, bs), jnp.float32),
        grid=(mbs // mblk, nk),
        in_specs=[pl.BlockSpec((mblk, bs, tk), lambda m, k: (m, 0, k))],
        out_specs=pl.BlockSpec((mblk, bs, bs), lambda m, k: (m, 0, 0)),
        scratch_shapes=[pltpu.VMEM((mblk, bs, bs), jnp.float32)],
        compiler_params=pltpu.CompilerParams(
            dimension_semantics=("parallel", "arbitrary"),
            vmem_limit_bytes=vmem_limit_bytes),
    )(feats)

    # --- Kernel 2: pairwise cosine similarity, off-diag mean ---------------
    gflat = grams.reshape(mbs, bs * bs)         # contiguous reshape (free)
    if tk2 is None:
        tk2 = _largest_aligned_divisor(bs * bs, 64 * 1024, 128)
    assert (bs * bs) % tk2 == 0 and (tk2 == bs * bs or tk2 % 128 == 0), "invalid tile"
    nt2 = (bs * bs) // tk2

    out = pl.pallas_call(
        functools.partial(_pairwise_cossim_kernel, eps=float(eps), mbs=mbs,
                          off_count=off_count),
        out_shape=jax.ShapeDtypeStruct((1, 1), jnp.float32),
        grid=(nt2,),
        in_specs=[pl.BlockSpec((mbs, tk2), lambda t: (0, t))],
        out_specs=pl.BlockSpec(memory_space=pltpu.MemorySpace.SMEM),
        scratch_shapes=[pltpu.VMEM((mbs, mbs), jnp.float32)],
        compiler_params=pltpu.CompilerParams(
            dimension_semantics=("arbitrary",),
            vmem_limit_bytes=vmem_limit_bytes),
    )(gflat)

    return out[0, 0], grams


# ---------------------------------------------------------------------------
# Pure-JAX reference (matches the PyTorch forward)
# ---------------------------------------------------------------------------
def _reference(feats, eps=1e-6, center=True):
    feats = jnp.asarray(feats, jnp.float32)
    mbs, bs = feats.shape[:2]
    x = feats.reshape(mbs, bs, -1)
    g = jnp.einsum('mbd,mcd->mbc', x, x)
    if center:
        row = g.mean(axis=2, keepdims=True)
        col = g.mean(axis=1, keepdims=True)
        tot = g.mean(axis=(1, 2), keepdims=True)
        g = g - row - col + tot
    gf = g.reshape(mbs, -1)
    m = gf @ gf.T
    norms = jnp.sqrt(jnp.diag(m))
    c = m / (norms[:, None] * norms[None, :] + eps)
    mask = 1.0 - jnp.eye(mbs)
    return (c * mask).sum() / (mbs * (mbs - 1)), g


if __name__ == "__main__":
    key = jax.random.PRNGKey(0)
    # (model_bs=3, batch=16, per-sample features 4x64 -> D=256)
    feats = jax.random.normal(key, (3, 16, 4, 64), dtype=jnp.float32)

    ref_pcosim, ref_grams = _reference(feats)

    # f32 MXU path; small explicit tiles so both K-tiling (nk=2) and the
    # kernel-2 reduction tiling (nt2=2) are exercised at the toy shape.
    pcosim, grams = cka_model_kernel(feats, eps=1e-6, center=True,
                                     tk=128, tk2=128)
    jax.block_until_ready((pcosim, grams))
    assert jnp.allclose(grams, ref_grams, atol=1e-2, rtol=1e-3), "gram mismatch"
    assert jnp.allclose(pcosim, ref_pcosim, atol=1e-4, rtol=1e-4), "cossim mismatch"

    # bf16 MXU-feed fast path (v6e/v7x); f32 accumulation, looser tolerance.
    pcosim_bf16, grams_bf16 = cka_model_kernel(feats, eps=1e-6, center=True,
                                               use_bf16_mxu=True, tk=128, tk2=128)
    jax.block_until_ready((pcosim_bf16, grams_bf16))
    assert jnp.abs(pcosim_bf16 - ref_pcosim) < 5e-2, "bf16 cossim drift too large"

    print("KERNEL_OK")
</pallas_src>

<mosaic_0001>
module attributes {stable_mosaic.version = 11 : i64} {
  func.func @_gram_kernel(%arg0: i32, %arg1: i32, %arg2: memref<3x16x128xf32, #tpu.memory_space<vmem>>, %arg3: memref<3x16x16xf32, #tpu.memory_space<vmem>>, %arg4: memref<3x16x16xf32, #tpu.memory_space<vmem>>) attributes {dimension_semantics = [#tpu.dimension_semantics<parallel>, #tpu.dimension_semantics<arbitrary>], iteration_bounds = array<i64: 1, 2>, scalar_prefetch = 0 : i64, scratch_operands = 1 : i64, tpu.core_type = #tpu.core_type<tc>, window_params = [{transform_indices = @transform_0, window_bounds = array<i64: 3, 16, 128>}, {transform_indices = @transform_1, window_bounds = array<i64: 3, 16, 16>}]} {
    %c0_i32 = arith.constant 0 : i32
    %0 = arith.cmpi eq, %arg1, %c0_i32 : i32
    %1 = arith.extui %0 : i1 to i32
    %c0_i32_0 = arith.constant 0 : i32
    %2 = arith.cmpi ne, %1, %c0_i32_0 : i32
    scf.if %2 {
      %cst_12 = arith.constant 0.000000e+00 : f32
      %17 = vector.broadcast %cst_12 : f32 to vector<3x16x16xf32>
      %c0_13 = arith.constant 0 : index
      %c0_14 = arith.constant 0 : index
      %c0_15 = arith.constant 0 : index
      %18 = vector.load %arg4[%c0_13, %c0_14, %c0_15] : memref<3x16x16xf32, #tpu.memory_space<vmem>>, vector<3x16x16xf32>
      tpu.vector_store %arg4[%c0_13, %c0_14, %c0_15], %17 {strides = array<i32>} : memref<3x16x16xf32, #tpu.memory_space<vmem>>, vector<3x16x16xf32>,
    } else {
    }
    %c0 = arith.constant 0 : index
    %c0_1 = arith.constant 0 : index
    %c0_2 = arith.constant 0 : index
    %3 = vector.load %arg2[%c0, %c0_1, %c0_2] : memref<3x16x128xf32, #tpu.memory_space<vmem>>, vector<3x16x128xf32>
    %cst = arith.constant dense<0.000000e+00> : vector<3x128xf32>
    %4 = vector.multi_reduction <add>, %3, %cst [1] : vector<3x16x128xf32> to vector<3x128xf32>
    %5 = vector.shape_cast %4 : vector<3x128xf32> to vector<3x1x128xf32>
    %cst_3 = arith.constant 1.600000e+01 : f32
    %6 = vector.broadcast %cst_3 : f32 to vector<3x1x128xf32>
    %7 = arith.divf %5, %6 : vector<3x1x128xf32>
    %8 = vector.broadcast %7 : vector<3x1x128xf32> to vector<3x16x128xf32>
    %9 = arith.subf %3, %8 : vector<3x16x128xf32>
    %c0_4 = arith.constant 0 : index
    %c0_5 = arith.constant 0 : index
    %c0_6 = arith.constant 0 : index
    %10 = vector.load %arg4[%c0_4, %c0_5, %c0_6] : memref<3x16x16xf32, #tpu.memory_space<vmem>>, vector<3x16x16xf32>
    "tpu.trace_start"() <{level = 10 : i32, message = "mbd,mcd->mbc"}> : () -> ()
    %cst_7 = arith.constant dense<0.000000e+00> : vector<3x16x16xf32>
    %11 = tpu.matmul %9, %9, %cst_7 {dimension_numbers = #tpu.dot_dimension_numbers<[2], [2], [1], [1], [0, 0, 0, 1, 1, 1], [0], [0]>} : vector<3x16x128xf32>, vector<3x16x128xf32>, vector<3x16x16xf32> -> vector<3x16x16xf32>
    "tpu.trace_stop"() : () -> ()
    %12 = arith.addf %10, %11 : vector<3x16x16xf32>
    %c0_8 = arith.constant 0 : index
    %c0_9 = arith.constant 0 : index
    %c0_10 = arith.constant 0 : index
    %13 = vector.load %arg4[%c0_8, %c0_9, %c0_10] : memref<3x16x16xf32, #tpu.memory_space<vmem>>, vector<3x16x16xf32>
    tpu.vector_store %arg4[%c0_8, %c0_9, %c0_10], %12 {strides = array<i32>} : memref<3x16x16xf32, #tpu.memory_space<vmem>>, vector<3x16x16xf32>,
    %c1_i32 = arith.constant 1 : i32
    %14 = arith.cmpi eq, %arg1, %c1_i32 : i32
    %15 = arith.extui %14 : i1 to i32
    %c0_i32_11 = arith.constant 0 : i32
    %16 = arith.cmpi ne, %15, %c0_i32_11 : i32
    scf.if %16 {
      %c0_12 = arith.constant 0 : index
      %c0_13 = arith.constant 0 : index
      %c0_14 = arith.constant 0 : index
      %17 = vector.load %arg4[%c0_12, %c0_13, %c0_14] : memref<3x16x16xf32, #tpu.memory_space<vmem>>, vector<3x16x16xf32>
      %c0_15 = arith.constant 0 : index
      %c0_16 = arith.constant 0 : index
      %c0_17 = arith.constant 0 : index
      %18 = vector.load %arg3[%c0_15, %c0_16, %c0_17] : memref<3x16x16xf32, #tpu.memory_space<vmem>>, vector<3x16x16xf32>
      tpu.vector_store %arg3[%c0_15, %c0_16, %c0_17], %17 {strides = array<i32>} : memref<3x16x16xf32, #tpu.memory_space<vmem>>, vector<3x16x16xf32>,
    } else {
    }
    return
  }
  func.func @transform_0(%arg0: i32, %arg1: i32) -> (i32, i32, i32) {
    %c0_i32 = arith.constant 0 : i32
    %c0_i32_0 = arith.constant 0 : i32
    return %arg0, %c0_i32, %arg1 : i32, i32, i32
  }
  func.func @transform_1(%arg0: i32, %arg1: i32) -> (i32, i32, i32) {
    %c0_i32 = arith.constant 0 : i32
    %c0_i32_0 = arith.constant 0 : i32
    %c0_i32_1 = arith.constant 0 : i32
    return %arg0, %c0_i32, %c0_i32_0 : i32, i32, i32
  }
}

</mosaic_0001>

<bundles_post_ra>
// kernel: tpu_custom_call.1
= control target key start
LH: loop header
LB: loop body
LE: loop exit
PB: predicated region body
PF: predicated region fallthrough
CT: control target
= control target key end

     0   :  { %6 = vsyncpa [#allocation4], 0  ;;  %s945_s0 = inlined_call_operand.hbm [shape: f32[3,16,256], index: 0, kind: input, shape index: {}]   ;;  %s946_s1 = inlined_call_operand.hbm [shape: f32[3,16,16], index: 1, kind: output, shape index: {}]  }
   0x1   :  { %8 = vsyncpa [#allocation4 + $0x1], 0 }
   0x2   :  { %9 = vsyncpa [#allocation5], 0  ;;  %s786_s6 = smov 0   ;;  %s788_s7 = smov 0  }
   0x3   :  { %s790_s8 = smov 0   ;;  %s792_s9 = smov 0  }
   0x4   :  { %s794_s10 = smov 0   ;;  %s796_s11 = smov 0  }
   0x5 LB: > { %s530_s12 = sadd.s32 4294967295, %s766_s11   ;;  %s24_s13 = sadd.s32 1, %s762_s10  ;;  %s766_s11 = sphi %s796_s11, %s15_s11   ;;  %s762_s10 = sphi %s794_s10, %s955_s10   ;;  %s758_s9 = sphi %s792_s9, %s954_s9   ;;  %s754_s8 = sphi %s790_s8, %s953_s8   ;;  %s750_s7 = sphi %s788_s7, %s952_s7   ;;  %s746_s6 = sphi %s786_s6, %s951_s6  }
   0x6   : > { %p25_p0 = scmp.ge.s32.totalorder %s24_s13, 2  ;;  %s36_s14 = sadd.s32 1, %s754_s8 }
   0x7   : > { %p43_p1 = scmp.ne.s32.totalorder %s754_s8, %s750_s7  ;;  %p44_p2 = scmp.eq.s32.totalorder %s766_s11, 0 }
   0x8   : > { %s957_s13 = smov (%p25_p0, %s24_s13), 0  ;;  %p49_p4 = scmp.ne.s32.totalorder %s750_s7, %s746_s6 }
   0x9   : > { %p45_p3 = por %p44_p2, %p43_p1  ;;  %s32_s15 = ssub.s32 %s762_s10, %s957_s13 }
   0xa   : > { %p50_p5 = scmp.eq.s32.totalorder %s530_s12, 0  ;;  %p34_p6 = scmp.eq.s32.totalorder %s32_s15, 0 }
   0xb   : > { %p598_p8 = scmp.lt.s32.totalorder %s766_s11, 2  ;;  %s99_s18 = sand.u32 1, %s754_s8  }
   0xc   : > { %p827_p7 = por %p50_p5, %p49_p4  ;;  %s533_s19 = sshll.u32 %s762_s10, 7 }
   0xd   : > { %s833_s17 = scalar_select %p34_p6, %s754_s8, %s36_s14  }
   0xe   : > { %s586_s20 = smul.u32 48, %s99_s18  ;;  %s840_s23 = scalar_lea.hbm %s945_s0, %s533_s19 }
   0xf   : > { %p842_p9 = pnand %p598_p8, %p45_p3  ;;  %s849_s27 = scalar_lea.sflag [#allocation4], %s99_s18 }
  0x10   : > { %s103_s25 = scalar_lea.vmem [#allocation3], %s586_s20  ;;  %s656_s28 = scalar_lea.hbm %s840_s23, 768 }
  0x11   : > { %s112_s26 = sshll.u32 %s103_s25, 4  ;;  %p657_p11 = scmp.ne.s32.totalorder %s840_s23, %s656_s28  ;;  %s846_s26 = int_to_ptr.vmem [resolvable:$true] %s112_s26 }
  0x12   : > { %p658_p12 = pneg %p842_p9  ;;  %s661_s2 = scalar_lea.hbm %s945_s0, 1536 }
  0x13   : > { %p662_p1 = scmp.lt.u32.totalorder %s840_s23, %s945_s0  ;;  %p663_p2 = scmp.lt.u32.totalorder %s661_s2, %s656_s28 }
  0x14   : > { %p659_p13 = pnand %p658_p12, %p657_p11  ;;  %p665_p4 = scmp.lt.u32.totalorder %s656_s28, %s840_s23 }
  0x15   : > { %p664_p3 = por %p663_p2, %p662_p1 }
  0x16   : > { %p660_p0 = pneg %p659_p13 }
  0x17   : > { %p666_p5 = por %p665_p4, %p664_p3 }
  0x19   : > { %p667_p6 = pnand %p666_p5, %p660_p0 }
  0x1b   : > { %670 = shalt.err (!%p667_p6)
}
  0x1c   : > { %s671_s5 = scalar_lea.vmem %s846_s26, 768  ;;  %s768_s6 = smov [#allocation3]  }
  0x1d   : > { %p672_p8 = scmp.ne.s32.totalorder %s846_s26, %s671_s5  ;;  %s676_s14 = sshll.u32 %s768_s6, 4  ;;  %s677_s14 = int_to_ptr.vmem [resolvable:$false] %s676_s14 }
  0x1e   : > { %s678_s15 = scalar_lea.vmem %s677_s14, 1536  ;;  %p679_p10 = scmp.lt.s32.totalorder %s846_s26, %s677_s14 }
  0x1f   : > { %p674_p11 = pnand %p672_p8, %p658_p12  ;;  %p680_p1 = scmp.lt.s32.totalorder %s678_s15, %s671_s5 }
  0x21   : > { %p675_p13 = pneg %p674_p11  ;;  %p681_p2 = por %p680_p1, %p679_p10 }
  0x23   : > { %p682_p3 = pnand %p681_p2, %p675_p13 }
  0x25   : > { %685 = shalt.err (!%p682_p3)
}
  0x26   : > { %s769_s18 = smov 256   ;;  %s770_s19 = smov 128  }
  0x27   : > { %s771_s20 = smov 8   ;;  %p120_p12 = scmp.lt.s32.totalorder %s766_s11, 3 }
  0x28   : > { %597 = dma.hbm_to_vmem [thread:$0]  (!%p842_p9), %s840_s23, 768, %s846_s26, %s849_s27, %s769_s18, %s770_s19, %s771_s20  }
  0x29   : > { %p949_p0 = scmp.ge.s32.totalorder %s766_s11, 1 }
  0x2b   : > { %p121_p4 = pnand %p949_p0, %p120_p12 }
  0x2c   : > { %s126_s21 = sand.u32 (!%p121_p4), 1, %s750_s7  }
  0x2d   : > { %124 = sbr.rel (%p121_p4) target bundleno = 349 (0x15d), region = 24  ;;  %s127_s25 = scalar_lea.sflag (!%p121_p4), [#allocation4], %s126_s21 }
  0x2e   : > { %s587_s22 = smul.u32 (!%p121_p4), 48, %s126_s21 }
  0x30   : > { %s130_s28 = scalar_lea.vmem (!%p121_p4), [#allocation3], %s587_s22 }
  0x34   : > { %737 = dma.done.wait (%p827_p7), %s127_s25, 768  }
  0x35   : > { %739 = vsyncadd (%p827_p7), %s127_s25, 4294966528  ;;  %p535_p10 = scmp.ne.s32.totalorder %s758_s9, 0 }
  0x36   : > { %vm150_vm0 = vcmask (!%p535_p10), 130048   ;;  %v772_v0 = vmov (!%p535_p10), 0.0  }
  0x37   : > { %149 = sbr.rel (%p535_p10) target bundleno = 62 (0x3e), region = 32  ;;  %151 = vst.msk [vmem:[#allocation2] sm:$0xff] (!%p535_p10), %vm150_vm0, %v772_v0  ;;  %152 = vst.msk [vmem:[#allocation2 + $0x8] sm:$0xff] (!%p535_p10), %vm150_vm0, %v772_v0 }
  0x38   : > { %153 = vst.msk [vmem:[#allocation2 + $0x10] sm:$0xff] (!%p535_p10), %vm150_vm0, %v772_v0  ;;  %154 = vst.msk [vmem:[#allocation2 + $0x18] sm:$0xff] (!%p535_p10), %vm150_vm0, %v772_v0 }
  0x39   : > { %155 = vst.msk [vmem:[#allocation2 + $0x20] sm:$0xff] (!%p535_p10), %vm150_vm0, %v772_v0  ;;  %156 = vst.msk [vmem:[#allocation2 + $0x28] sm:$0xff] (!%p535_p10), %vm150_vm0, %v772_v0 }
  0x3e PF: > { %v157_v1 = vld [vmem:[%s130_s28] sm:$0xff]  ;;  %v158_v2 = vld [vmem:[%s130_s28 + $0x8] sm:$0xff]  ;;  %v159_v3 = vld [vmem:[%s130_s28 + $0x10] sm:$0xff]  ;;  %vm431_vm1 = vcmask 130048   ;;  %p536_p7 = scmp.ne.s32.totalorder %s758_s9, 1 }
  0x3f   : > { %v163_v4 = vadd.f32 %v158_v2, %v157_v1  ;;  %v160_v5 = vld [vmem:[%s130_s28 + $0x18] sm:$0xff]  ;;  %v161_v6 = vld [vmem:[%s130_s28 + $0x20] sm:$0xff]  ;;  %v162_v7 = vld [vmem:[%s130_s28 + $0x28] sm:$0xff] }
  0x40   : > { %v170_v8 = vadd.f32 %v160_v5, %v159_v3  ;;  %v177_v9 = vadd.f32 %v162_v7, %v161_v6  ;;  %v195_v40 = vld [vmem:[#allocation2 + $0x8] sm:$0xff]  ;;  %v194_v41 = vld [vmem:[#allocation2] sm:$0xff]  ;;  %v197_v42 = vld [vmem:[#allocation2 + $0x18] sm:$0xff] }
  0x41   : > { %v164_v10 = vrot.slane %v163_v4, 4  ;;  %v196_v44 = vld [vmem:[#allocation2 + $0x10] sm:$0xff]  ;;  %v199_v52 = vld [vmem:[#allocation2 + $0x28] sm:$0xff]  ;;  %v198_v53 = vld [vmem:[#allocation2 + $0x20] sm:$0xff] }
  0x42   : > { %v171_v11 = vrot.slane %v170_v8, 4  ;;  %v178_v12 = vrot.slane %v177_v9, 4 }
  0x43   : > { %v165_v13 = vadd.f32 %v164_v10, %v163_v4 }
  0x44   : > { %v172_v14 = vadd.f32 %v171_v11, %v170_v8  ;;  %v179_v15 = vadd.f32 %v178_v12, %v177_v9 }
  0x45   : > { %v166_v16 = vrot.slane %v165_v13, 2 }
  0x46   : > { %v173_v17 = vrot.slane %v172_v14, 2  ;;  %v180_v18 = vrot.slane %v179_v15, 2 }
  0x47   : > { %v167_v19 = vadd.f32 %v166_v16, %v165_v13 }
  0x48   : > { %v174_v20 = vadd.f32 %v173_v17, %v172_v14  ;;  %v181_v21 = vadd.f32 %v180_v18, %v179_v15 }
  0x49   : > { %v168_v22 = vrot.slane %v167_v19, 1 }
  0x4a   : > { %v175_v23 = vrot.slane %v174_v20, 1  ;;  %v182_v24 = vrot.slane %v181_v21, 1 }
  0x4b   : > { %v169_v25 = vadd.f32 %v168_v22, %v167_v19 }
  0x4c   : > { %v176_v26 = vadd.f32 %v175_v23, %v174_v20  ;;  %v183_v27 = vadd.f32 %v182_v24, %v181_v21 }
  0x4d   : > { %v185_v28 = vmul.f32 0.0625, %v169_v25 }
  0x4e   : > { %v186_v29 = vmul.f32 0.0625, %v176_v26  ;;  %v187_v30 = vmul.f32 0.0625, %v183_v27 }
  0x4f   : > { %v188_v31 = vsub.f32 %v157_v1, %v185_v28  ;;  %v189_v32 = vsub.f32 %v158_v2, %v185_v28 }
  0x50   : > { %v190_v33 = vsub.f32 %v159_v3, %v186_v29  ;;  %v191_v34 = vsub.f32 %v160_v5, %v186_v29  ;;  %v192_v35 = vsub.f32 %v161_v6, %v187_v30  ;;  %v193_v36 = vsub.f32 %v162_v7, %v187_v30 }
  0x51   : > { %v574_v37 = vpack.c.bf16 %v189_v32, %v188_v31  ;;  %557 = vmatprep.mubr.f32.mxu0 %v188_v31 }
  0x52   : > { %v578_v38 = vpack.c.bf16 %v191_v34, %v190_v33  ;;  %v582_v39 = vpack.c.bf16 %v193_v36, %v192_v35  ;;  %564 = vmatprep.mubr.f32.mxu1 %v190_v33 }
  0x53   : > { %575 = vmatprep.subr.bf16.mxu0 %v574_v37 }
  0x54   : > { %577 = vmatpush3.bf16.xpose.msra.mxu0 %v574_v37  ;;  %579 = vmatprep.subr.bf16.mxu1 %v578_v38 }
  0x55   : > { %581 = vmatpush3.bf16.xpose.msra.mxu1 %v578_v38  ;;  %583 = vmatprep.subr.bf16.mxu0 %v582_v39 }
  0x5b   : > { %558 = vmatmul.mubr.f32.vlgmr.msra.gmra.mrb[0].mxu0 %v189_v32 }
  0x5c   : > { %585 = vmatpush3.bf16.xpose.msra.mxu0 %v582_v39  ;;  %565 = vmatmul.mubr.f32.vlgmr.msra.gmra.mrb[0].mxu1 %v191_v34 }
  0x5d   : > { %571 = vmatprep.mubr.f32.mxu0 %v192_v35 }
  0x63   : > { %572 = vmatmul.mubr.f32.vlgmr.msra.gmra.mrb[2].mxu0 %v193_v36 }
 0x12e   : > { %v559_v43 = vpop.f32.mrb[0].mxu0 }
 0x12f   : > { %v426_v45 = vadd.f32 %v559_v43, %v195_v40  ;;  %v266_v46 = vpop.f32.mrb[1].mxu0  ;;  %v566_v47 = vpop.f32.mrb[0].mxu1 }
 0x130   : > { %v425_v48 = vadd.f32 %v266_v46, %v194_v41  ;;  %v428_v49 = vadd.f32 %v566_v47, %v197_v42  ;;  %v341_v50 = vpop.f32.mrb[1].mxu1 }
 0x131   : > { %433 = vst.msk [vmem:[#allocation2 + $0x8] sm:$0xff] %vm431_vm1, %v426_v45  ;;  %v427_v51 = vadd.f32 %v341_v50, %v196_v44 }
 0x132   : > { %432 = vst.msk [vmem:[#allocation2] sm:$0xff] %vm431_vm1, %v425_v48  ;;  %435 = vst.msk [vmem:[#allocation2 + $0x18] sm:$0xff] %vm431_vm1, %v428_v49 }
 0x133   : > { %434 = vst.msk [vmem:[#allocation2 + $0x10] sm:$0xff] %vm431_vm1, %v427_v51 }
 0x134   : > { %441 = sbr.rel (%p536_p7) target bundleno = 323 (0x143), region = 36 }
 0x136   : > { %v573_v54 = vpop.f32.mrb[2].mxu0 }
 0x137   : > { %v430_v55 = vadd.f32 %v573_v54, %v199_v52  ;;  %v416_v56 = vpop.f32.mrb[3].mxu0 }
 0x138   : > { %v429_v57 = vadd.f32 %v416_v56, %v198_v53  ;;  %v443_v59 = vld [vmem:[#allocation2 + $0x8] sm:$0xff] (!%p536_p7) }
 0x139   : > { %437 = vst.msk [vmem:[#allocation2 + $0x28] sm:$0xff] %vm431_vm1, %v430_v55  ;;  %v442_v58 = vld [vmem:[#allocation2] sm:$0xff] (!%p536_p7)  ;;  %449 = vst.msk [vmem:[#allocation6 + $0x8] sm:$0xff] (!%p536_p7), %vm431_vm1, %v443_v59  ;;  %v445_v61 = vld [vmem:[#allocation2 + $0x18] sm:$0xff] (!%p536_p7) }
 0x13a   : > { %436 = vst.msk [vmem:[#allocation2 + $0x20] sm:$0xff] %vm431_vm1, %v429_v57  ;;  %v444_v60 = vld [vmem:[#allocation2 + $0x10] sm:$0xff] (!%p536_p7)  ;;  %448 = vst.msk [vmem:[#allocation6] sm:$0xff] (!%p536_p7), %vm431_vm1, %v442_v58 }
 0x13b   : > { %450 = vst.msk [vmem:[#allocation6 + $0x10] sm:$0xff] %vm431_vm1, %v444_v60  ;;  %451 = vst.msk [vmem:[#allocation6 + $0x18] sm:$0xff] %vm431_vm1, %v445_v61 }
 0x140   : > { %v447_v63 = vld [vmem:[#allocation2 + $0x28] sm:$0xff] }
 0x141   : > { %v446_v62 = vld [vmem:[#allocation2 + $0x20] sm:$0xff]  ;;  %453 = vst.msk [vmem:[#allocation6 + $0x28] sm:$0xff] %vm431_vm1, %v447_v63 }
 0x142   : > { %452 = vst.msk [vmem:[#allocation6 + $0x20] sm:$0xff] %vm431_vm1, %v446_v62 }
 0x143 PF: > { %p901_p9 = scmp.eq.s32.totalorder %s530_s12, 1  ;;  %s773_s16 = smov [#allocation6]  }
 0x144   : > { %s464_s23 = sshll.u32 %s773_s16, 4  ;;  %s465_s23 = int_to_ptr.vmem [resolvable:$true] %s464_s23 }
 0x145   : > { %s686_s24 = scalar_lea.vmem %s465_s23, 768  ;;  %p693_p11 = scmp.lt.s32.totalorder %s465_s23, %s465_s23 }
 0x146   : > { %p687_p5 = scmp.ne.s32.totalorder %s465_s23, %s686_s24  ;;  %p694_p13 = scmp.lt.s32.totalorder %s686_s24, %s686_s24 }
 0x148   : > { %p688_p6 = pnand %p687_p5, %p901_p9  ;;  %p695_p1 = por %p694_p13, %p693_p11 }
 0x14a   : > { %p689_p8 = pneg %p688_p6 }
 0x14c   : > { %p696_p2 = pnand %p695_p1, %p689_p8 }
 0x14e   : > { %699 = shalt.err (!%p696_p2)
}
 0x14f   : > { %s700_s12 = scalar_lea.hbm %s946_s1, 768 }
 0x150   : > { %p701_p3 = scmp.ne.s32.totalorder %s946_s1, %s700_s12  ;;  %p706_p4 = scmp.lt.u32.totalorder %s700_s12, %s946_s1 }
 0x152   : > { %p702_p12 = pnand %p701_p3, %p901_p9 }
 0x154   : > { %p703_p0 = pneg %p702_p12 }
 0x156   : > { %p708_p10 = pnand %p706_p4, %p703_p0 }
 0x158   : > { %711 = shalt.err (!%p708_p10)
}
 0x159   : > { %s774_s4 = smov 128   ;;  %s775_s5 = smov 8  }
 0x15a   : > { %591 = dma.vmem_to_hbm [thread:$0]  (%p901_p9), %s465_s23, 768, %s946_s1, [#allocation5], %s774_s4, %s774_s4, %s775_s5  }
 0x15b   : > { %741 = dma.done.wait (%p901_p9), [#allocation5], 768  }
 0x15c   : > { %743 = vsyncadd (%p901_p9), [#allocation5], 4294966528 }
 0x15d PF: > { %s15_s11 = sadd.s32 1, %s766_s11   ;;  %s951_s6 = smov %s750_s7 }
 0x15e   : > { %p12_p7 = scmp.ge.s32.totalorder %s15_s11, 4   ;;  %s952_s7 = smov %s754_s8 }
 0x15f   : > { %s953_s8 = smov %s833_s17  ;;  %s954_s9 = smov %s762_s10 }
 0x160   : > { %s955_s10 = smov %s957_s13  ;;  %14 = sbr.rel (!%p12_p7) target bundleno = 5 (0x5), region = 70 }
 0x167   :  { %480 = vsyncpa [#allocation4], 1 }
 0x168   :  { %482 = vsyncpa [#allocation4 + $0x1], 1 }
 0x169   :  { %483 = vsyncpa [#allocation5], 1 }
 0x16a   :  { %485 = vsyncpa [#allocation5 + $0x1], 1 }

</bundles_post_ra>
